<compile_context>
chip_gen: v6e
topology: v6e:2x2x1
jax: 0.10.0
libtpu: 0.0.40
codegen_flags: <defaults>
</compile_context>

<pallas_src>
import jax
import jax.numpy as jnp
from jax.experimental import pallas as pl
from jax.experimental.pallas import tpu as pltpu


_BLOCK_BYTES = 8 * 1024 * 1024        # ~8 MiB/block -> 32 MiB pipelined (in+out, x2 buf)
_SMALL_INPUT_ELEMS = 64 * 1024        # below this, plain fused XLA wins over a kernel launch


def _gauss_kernel(coef_ref, d_ref, o_ref):
    # coef_ref: SMEM (1,) scalar = -1 / (2 * std^2), precomputed in the wrapper.
    # d_ref / o_ref: lane-dense VMEM blocks of the flattened input / output.
    coef = coef_ref[0]
    d = d_ref[...].astype(jnp.float32)            # compute in f32 (handles bf16 inputs)
    o_ref[...] = jnp.exp(d * d * coef).astype(o_ref.dtype)


def _chip_config():
    """Return (block_bytes, vmem_limit_bytes, n_tensorcores) for the local TPU."""
    block_bytes = _BLOCK_BYTES
    vmem_limit = 64 * 1024 * 1024                 # plenty on 128 MiB VMEM chips (v5e/v6e)
    n_tc = 1
    try:
        info = pltpu.get_tpu_info()
        vmem_cap = getattr(info, "vmem_capacity_bytes", None)
        if vmem_cap is not None and int(vmem_cap) <= 80 * 1024 * 1024:
            # v7x-class (64 MiB physical VMEM): 4 x 8 MiB buffers + headroom.
            vmem_limit = 40 * 1024 * 1024
    except Exception:
        pass
    try:
        kind = jax.devices()[0].device_kind.lower()
        if "v7" in kind:
            n_tc = 2                              # megacore: 2 TensorCores per chip
    except Exception:
        pass
    return block_bytes, vmem_limit, n_tc


def gauss_forward(d: jax.Array, std, *, min_pallas_elems: int = _SMALL_INPUT_ELEMS) -> jax.Array:
    """exp(d^2 / (-2 * std^2)), elementwise; same shape/dtype as d."""
    orig_shape = d.shape
    dtype = d.dtype
    total = int(d.size)
    if total == 0:                                # guard zero-size grids
        return d

    # Precompute the scalar coefficient once (f32).
    s = jnp.asarray(std, dtype=jnp.float32).reshape(())
    coef = -1.0 / (2.0 * s * s)

    # Tiny inputs: kernel launch / fixed overhead dominates -> fused XLA path.
    if total < min_pallas_elems:
        x = d.astype(jnp.float32)
        return jnp.exp(x * x * coef).astype(dtype)

    itemsize = jnp.dtype(dtype).itemsize
    # Sublane alignment for this dtype's tiling (8 f32, 16 bf16, 32 int8).
    row_align = max(8, 32 // itemsize)

    flat = d.reshape(-1)                          # layout-compatible -> free bitcast

    # Lane-dense flat layout (R, LANE): pick the widest lane that divides `total`
    # so the common case needs no padding and no extra HBM copies.
    pad = 0
    if total % 512 == 0:
        lane = 512
    elif total % 256 == 0:
        lane = 256
    elif total % 128 == 0:
        lane = 128
    else:
        lane = 128
        pad = (-total) % lane                     # < 128 elements
        # TODO(synk): for large non-128-divisible totals this concatenate/slice pair
        # still costs one extra HBM round-trip; a manual-DMA (memory_space=pl.ANY)
        # ragged-tail path would remove it, but such shapes do not occur for the
        # conv-style distance maps fed to `gauss` in RGB_SFMCNN_V2.
        flat = jnp.concatenate([flat, jnp.zeros((pad,), dtype)])

    R = (total + pad) // lane
    d2 = flat.reshape(R, lane)

    block_bytes, vmem_limit, n_tc = _chip_config()

    # Block rows: ~block_bytes per block, multiple of the dtype's sublane alignment.
    max_rows = max(
        row_align,
        (block_bytes // (lane * itemsize)) // row_align * row_align,
    )
    block_r = min(R, max_rows)

    # Megacore (v7x only): keep >= 4 grid steps (>= 2 per TensorCore) so each core's
    # input DMA stays double-buffered instead of fully exposed.  Single-TC chips
    # (v5e/v6e) keep one full-size block when the array fits -- splitting there is
    # pure per-step overhead.
    if n_tc >= 2 and R >= 4 * row_align:
        quarter = ((R + 3) // 4 + row_align - 1) // row_align * row_align
        block_r = min(block_r, max(row_align, quarter))

    grid = (pl.cdiv(R, block_r),)

    out2 = pl.pallas_call(
        _gauss_kernel,
        out_shape=jax.ShapeDtypeStruct((R, lane), dtype),
        grid_spec=pltpu.PrefetchScalarGridSpec(
            num_scalar_prefetch=0,
            grid=grid,
            in_specs=[
                pl.BlockSpec(memory_space=pltpu.SMEM),              # coef scalar
                pl.BlockSpec((block_r, lane), lambda i: (i, 0)),    # d block
            ],
            out_specs=pl.BlockSpec((block_r, lane), lambda i: (i, 0)),
        ),
        compiler_params=pltpu.CompilerParams(
            dimension_semantics=("parallel",),
            vmem_limit_bytes=vmem_limit,
        ),
    )(coef.reshape((1,)), d2)

    out_flat = out2.reshape(-1)
    if pad:
        out_flat = out_flat[:total]
    return out_flat.reshape(orig_shape)


if __name__ == "__main__":
    key = jax.random.PRNGKey(0)
    std = 2.0  # gauss.__init__(std=...) parameter

    def ref_fn(x):
        xf = x.astype(jnp.float32)
        return jnp.exp(jnp.square(xf) / (-2.0 * std * std)).astype(x.dtype)

    # 1) Module-sized demo input (NCHW distance map) -- small, so it takes the
    #    fused-XLA fast path.
    x = jax.random.normal(key, (2, 4, 16, 16), dtype=jnp.float32)
    y = jax.block_until_ready(gauss_forward(x, std))
    assert y.shape == x.shape and y.dtype == x.dtype
    assert jnp.allclose(y, ref_fn(x), atol=1e-6, rtol=1e-5), "mismatch (small path)"

    # 2) Force the Pallas kernel at the demo shape as well (zero-pad path, lane=512).
    y_forced = jax.block_until_ready(gauss_forward(x, std, min_pallas_elems=1))
    assert jnp.allclose(y_forced, ref_fn(x), atol=1e-6, rtol=1e-5), "mismatch (forced Pallas)"

    # 3) Larger feature-map-sized input: Pallas path, zero padding, lane=512.
    x_big = jax.random.normal(jax.random.PRNGKey(1), (4, 16, 32, 32), dtype=jnp.float32)
    y_big = jax.block_until_ready(gauss_forward(x_big, std))
    assert jnp.allclose(y_big, ref_fn(x_big), atol=1e-6, rtol=1e-5), "mismatch (big path)"

    # 4) Large total not divisible by 128: exercises the (rare) padded Pallas path.
    x_rag = jax.random.normal(jax.random.PRNGKey(2), (67, 1001), dtype=jnp.float32)
    y_rag = jax.block_until_ready(gauss_forward(x_rag, std))
    assert jnp.allclose(y_rag, ref_fn(x_rag), atol=1e-6, rtol=1e-5), "mismatch (ragged path)"

    print("KERNEL_OK")
</pallas_src>

<mosaic_0001>
module attributes {stable_mosaic.version = 11 : i64} {
  func.func @_gauss_kernel(%arg0: i32, %arg1: memref<1xf32, #tpu.memory_space<smem>>, %arg2: memref<4x512xf32, #tpu.memory_space<vmem>>, %arg3: memref<4x512xf32, #tpu.memory_space<vmem>>) attributes {dimension_semantics = [#tpu.dimension_semantics<parallel>], iteration_bounds = array<i64: 1>, scalar_prefetch = 0 : i64, scratch_operands = 0 : i64, tpu.core_type = #tpu.core_type<tc>, window_params = [{transform_indices = @transform_0, window_bounds = array<i64: 1>}, {transform_indices = @transform_1, window_bounds = array<i64: 4, 512>}, {transform_indices = @transform_2, window_bounds = array<i64: 4, 512>}]} {
    %c0 = arith.constant 0 : index
    %0 = memref.load %arg1[%c0] : memref<1xf32, #tpu.memory_space<smem>>
    %c0_0 = arith.constant 0 : index
    %c0_1 = arith.constant 0 : index
    %1 = vector.load %arg2[%c0_0, %c0_1] : memref<4x512xf32, #tpu.memory_space<vmem>>, vector<4x512xf32>
    %2 = arith.mulf %1, %1 : vector<4x512xf32>
    %3 = vector.broadcast %0 : f32 to vector<4x512xf32>
    %4 = arith.mulf %2, %3 : vector<4x512xf32>
    %5 = math.exp %4 : vector<4x512xf32>
    %c0_2 = arith.constant 0 : index
    %c0_3 = arith.constant 0 : index
    %6 = vector.load %arg3[%c0_2, %c0_3] : memref<4x512xf32, #tpu.memory_space<vmem>>, vector<4x512xf32>
    tpu.vector_store %arg3[%c0_2, %c0_3], %5 {strides = array<i32>} : memref<4x512xf32, #tpu.memory_space<vmem>>, vector<4x512xf32>,
    return
  }
  func.func @transform_0(%arg0: i32) -> i32 {
    %c0_i32 = arith.constant 0 : i32
    %c0_i32_0 = arith.constant 0 : i32
    return %c0_i32 : i32
  }
  func.func @transform_1(%arg0: i32) -> (i32, i32) {
    %c0_i32 = arith.constant 0 : i32
    %c0_i32_0 = arith.constant 0 : i32
    return %arg0, %c0_i32 : i32, i32
  }
  func.func @transform_2(%arg0: i32) -> (i32, i32) {
    %c0_i32 = arith.constant 0 : i32
    %c0_i32_0 = arith.constant 0 : i32
    return %arg0, %c0_i32 : i32, i32
  }
}

</mosaic_0001>

<bundles_post_ra>
// kernel: tpu_custom_call.1
= control target key start
LH: loop header
LB: loop body
LE: loop exit
PB: predicated region body
PF: predicated region fallthrough
CT: control target
= control target key end

     0   :  { %8 = vsyncpa [#allocation4], 0  ;;  %s130_s0 = inlined_call_operand.<no memory space> [shape: f32[1], index: 0, kind: input, shape index: {}]   ;;  %s131_s1 = inlined_call_operand.hbm [shape: f32[4,512], index: 1, kind: input, shape index: {}]   ;;  %s132_s2 = inlined_call_operand.hbm [shape: f32[4,512], index: 2, kind: output, shape index: {}]  }
   0x1   :  { %9 = vsyncpa [#allocation5], 0  ;;  %s104_s9 = smov [#allocation3]  }
   0x2   :  { %s18_s10 = sshll.u32 %s104_s9, 4  ;;  %s19_s10 = int_to_ptr.vmem [resolvable:$true] %s18_s10 }
   0x3   :  { %s68_s11 = scalar_lea.vmem %s19_s10, 256  ;;  %p73_p1 = scmp.lt.s32.totalorder %s19_s10, %s19_s10 }
   0x4   :  { %p69_p0 = scmp.ne.s32.totalorder %s19_s10, %s68_s11  ;;  %p74_p2 = scmp.lt.s32.totalorder %s68_s11, %s68_s11 }
   0x6   :  { %p75_p3 = por %p74_p2, %p73_p1 }
   0x8   :  { %p76_p4 = pnand %p75_p3, %p69_p0 }
   0xa   :  { %79 = shalt.err (!%p76_p4)
}
   0xb   :  { %21 = dma.hbm_to_vmem [thread:$0]  %s131_s1, 256, %s19_s10, [#allocation4]  }
   0xc   :  { %100 = dma.done.wait [#allocation4], 256  }
   0xd   :  { %101 = vsyncadd [#allocation4], 4294967040  ;;  %v26_v0 = vld [vmem:[#allocation3] sm:$0xff]  ;;  %v30_v1 = vstv %s130_s0  ;;  %v27_v2 = vld [vmem:[#allocation3 + $0x8] sm:$0xff]  ;;  %s105_s16 = smov [#allocation6]  }
   0xe   :  { %v28_v3 = vmul.f32 %v26_v0, %v26_v0  ;;  %v29_v4 = vmul.f32 %v27_v2, %v27_v2  ;;  %s45_s17 = sshll.u32 %s105_s16, 4  ;;  %s46_s17 = int_to_ptr.vmem [resolvable:$true] %s45_s17 }
   0xf   :  { %s80_s1 = scalar_lea.vmem %s46_s17, 256  ;;  %p85_p6 = scmp.lt.s32.totalorder %s46_s17, %s46_s17 }
  0x10   :  { %v31_v5 = vmul.f32 %v30_v1, %v28_v3  ;;  %v32_v6 = vmul.f32 %v30_v1, %v29_v4  ;;  %p81_p5 = scmp.ne.s32.totalorder %s46_s17, %s80_s1  ;;  %p86_p7 = scmp.lt.s32.totalorder %s80_s1, %s80_s1 }
  0x12   :  { %v33_v7 = vmul.f32 1.442695, %v31_v5  ;;  %v35_v8 = vmul.f32 1.442695, %v32_v6  ;;  %p87_p8 = por %p86_p7, %p85_p6 }
  0x14   :  { %56 = vpow2.f32 %v33_v7  ;;  %p88_p9 = pnand %p87_p8, %p81_p5 }
  0x15   :  { %58 = vpow2.f32 %v35_v8 }
  0x21   :  { %v57_v9 = vpop.eup %56 }
  0x22   :  { %v59_v10 = vpop.eup %58  ;;  %37 = vst [vmem:[#allocation6] sm:$0xff] %v57_v9 }
  0x23   :  { %38 = vst [vmem:[#allocation6 + $0x8] sm:$0xff] %v59_v10 }
  0x24   :  { %91 = shalt.err (!%p88_p9)
}
  0x25   :  { %48 = dma.vmem_to_hbm [thread:$0]  %s46_s17, 256, %s132_s2, [#allocation5]  }
  0x26   :  { %102 = dma.done.wait [#allocation5], 256  }
  0x27   :  { %103 = vsyncadd [#allocation5], 4294967040 }
  0x28   :  { %52 = vsyncpa [#allocation4], 1 }
  0x29   :  { %53 = vsyncpa [#allocation5], 1 }

</bundles_post_ra>
